<compile_context>
chip_gen: v6e
topology: v6e:2x2x1
jax: 0.10.0
libtpu: 0.0.40
codegen_flags: <defaults>
</compile_context>

<pallas_src>
import jax
import jax.numpy as jnp
from jax.experimental import pallas as pl
from jax.experimental.pallas import tpu as pltpu

IN_DIM = 5          # Linear in_features
OUT_DIM = 3         # Linear out_features
PACK = 8            # per-branch packed width (8 lanes: clean row granularity)
FUSED = 128         # fused weight/bias lane width: [branch0 | branch1 | zeros]
W_ROWS = 8          # weight rows padded 5 -> 8 (one clean (8,128) tile)

_SMALL_B = 256      # below this: one block (launch overhead dominates anyway)
_MAX_TILE = 2048    # keeps double-buffered blocks ~6 MiB: safe on v5e/v6e/v7x defaults


def _testmodel_kernel(k_ref, x_ref, wf_ref, bf_ref, o_ref):
    """y = x @ [W0^T | W1^T] + [b0 | b1] (VPU-unrolled over K=5), per-row branch select."""
    x = x_ref[...]                                   # (bt, IN_DIM) f32
    y = bf_ref[...]                                  # (1, FUSED) f32, broadcasts below
    for j in range(IN_DIM):                          # static unroll: 5 VPU FMAs
        y = y + x[:, j:j + 1] * wf_ref[j, :]         # (bt,1)*(FUSED,) -> (bt, FUSED)
    k = k_ref[...]                                   # (bt, 1) i32
    # branch-0 columns live in lanes [0, PACK), branch-1 in [PACK, 2*PACK).
    o_ref[...] = jnp.where(k == 0, y[:, :PACK], y[:, PACK:2 * PACK])


def prepare_params(w0, b0, w1, b1):
    """One-time packing of torch-layout params ((out,in), (out,)) into fused 128-lane slabs."""
    wf = jnp.zeros((W_ROWS, FUSED), jnp.float32)
    wf = wf.at[:IN_DIM, :OUT_DIM].set(jnp.asarray(w0, jnp.float32).T)
    wf = wf.at[:IN_DIM, PACK:PACK + OUT_DIM].set(jnp.asarray(w1, jnp.float32).T)
    bf = jnp.zeros((1, FUSED), jnp.float32)
    bf = bf.at[0, :OUT_DIM].set(jnp.asarray(b0, jnp.float32))
    bf = bf.at[0, PACK:PACK + OUT_DIM].set(jnp.asarray(b1, jnp.float32))
    return wf, bf


def _round_up(n, m):
    return ((n + m - 1) // m) * m


def _batch_plan(B):
    """Return (padded_B, tile) with padded_B % tile == 0 and tile sublane-aligned.

    For B > _SMALL_B the grid always has >= 2 steps (v7x megacore sharding) and the
    tile never exceeds _MAX_TILE (VMEM budget on all generations).  Ragged batches are
    handled by padding to a tile multiple, never by one giant block.
    """
    if B <= _SMALL_B:
        return B, B
    steps = max(2, -(-B // _MAX_TILE))
    tile = _round_up(-(-B // steps), 8)
    return steps * tile, tile


@jax.jit
def testmodel_forward(k, x, wf, bf):
    """k: (B,) int, x: (B, IN_DIM) float. Returns (B, OUT_DIM) f32."""
    B = x.shape[0]
    padded_B, bt = _batch_plan(B)

    k2 = k.reshape(B, 1).astype(jnp.int32)
    x32 = x.astype(jnp.float32)
    if padded_B != B:
        pad = padded_B - B
        k2 = jnp.pad(k2, ((0, pad), (0, 0)))      # padded rows: k=0, x=0 -> discarded
        x32 = jnp.pad(x32, ((0, pad), (0, 0)))

    packed = pl.pallas_call(
        _testmodel_kernel,
        out_shape=jax.ShapeDtypeStruct((padded_B, PACK), jnp.float32),
        grid=(padded_B // bt,),
        in_specs=[
            pl.BlockSpec((bt, 1), lambda i: (i, 0)),            # k
            pl.BlockSpec((bt, IN_DIM), lambda i: (i, 0)),       # x
            pl.BlockSpec((W_ROWS, FUSED), lambda i: (0, 0)),    # fused W^T (resident)
            pl.BlockSpec((1, FUSED), lambda i: (0, 0)),         # fused bias (resident)
        ],
        out_specs=pl.BlockSpec((bt, PACK), lambda i: (i, 0)),
        compiler_params=pltpu.CompilerParams(
            dimension_semantics=("parallel",)),
    )(k2, x32, wf, bf)

    # 8-lane packed slab out of the kernel; the real 3 columns are a cheap slice here.
    return packed[:B, :OUT_DIM]


def _reference(k, x, w0, b0, w1, b1):
    y0 = x @ w0.T + b0
    y1 = x @ w1.T + b1
    return jnp.where(k[:, None] == 0, y0, y1)


if __name__ == "__main__":
    key = jax.random.PRNGKey(0)
    kx, kk, kw0, kb0, kw1, kb1 = jax.random.split(key, 6)

    # PyTorch-style uniform(-1/sqrt(in_dim), 1/sqrt(in_dim)) init.
    bound = 1.0 / (IN_DIM ** 0.5)
    w0 = jax.random.uniform(kw0, (OUT_DIM, IN_DIM), jnp.float32, -bound, bound)
    b0 = jax.random.uniform(kb0, (OUT_DIM,), jnp.float32, -bound, bound)
    w1 = jax.random.uniform(kw1, (OUT_DIM, IN_DIM), jnp.float32, -bound, bound)
    b1 = jax.random.uniform(kb1, (OUT_DIM,), jnp.float32, -bound, bound)

    wf, bf = prepare_params(w0, b0, w1, b1)   # one-time param packing

    # Primary small-shape check (single-block path).
    B = 8
    x = jax.random.normal(kx, (B, IN_DIM), dtype=jnp.float32)
    k = jax.random.randint(kk, (B,), 0, 2, dtype=jnp.int32)
    out = jax.block_until_ready(testmodel_forward(k, x, wf, bf))
    ref = _reference(k, x, w0, b0, w1, b1)
    assert out.shape == (B, OUT_DIM)
    assert jnp.allclose(out, ref, atol=1e-5, rtol=1e-5)

    # Secondary check: ragged batch -> padded, 2-step "parallel" grid path.
    B2 = 261
    kx2, kk2 = jax.random.split(jax.random.PRNGKey(1))
    x2 = jax.random.normal(kx2, (B2, IN_DIM), dtype=jnp.float32)
    k2 = jax.random.randint(kk2, (B2,), 0, 2, dtype=jnp.int32)
    out2 = jax.block_until_ready(testmodel_forward(k2, x2, wf, bf))
    ref2 = _reference(k2, x2, w0, b0, w1, b1)
    assert out2.shape == (B2, OUT_DIM)
    assert jnp.allclose(out2, ref2, atol=1e-5, rtol=1e-5)

    print("KERNEL_OK")
</pallas_src>

<mosaic_0001>
module attributes {stable_mosaic.version = 11 : i64} {
  func.func @_testmodel_kernel(%arg0: i32, %arg1: memref<8x1xi32, #tpu.memory_space<vmem>>, %arg2: memref<8x5xf32, #tpu.memory_space<vmem>>, %arg3: memref<8x128xf32, #tpu.memory_space<vmem>>, %arg4: memref<1x128xf32, #tpu.memory_space<vmem>>, %arg5: memref<8x8xf32, #tpu.memory_space<vmem>>) attributes {dimension_semantics = [#tpu.dimension_semantics<parallel>], iteration_bounds = array<i64: 1>, scalar_prefetch = 0 : i64, scratch_operands = 0 : i64, tpu.core_type = #tpu.core_type<tc>, window_params = [{transform_indices = @transform_0, window_bounds = array<i64: 8, 1>}, {transform_indices = @transform_1, window_bounds = array<i64: 8, 5>}, {pipeline_mode = #tpu.pipeline_mode<synchronous>, transform_indices = @transform_2, window_bounds = array<i64: 8, 128>}, {pipeline_mode = #tpu.pipeline_mode<synchronous>, transform_indices = @transform_3, window_bounds = array<i64: 1, 128>}, {transform_indices = @transform_4, window_bounds = array<i64: 8, 8>}]} {
    %c0 = arith.constant 0 : index
    %c0_0 = arith.constant 0 : index
    %0 = vector.load %arg2[%c0, %c0_0] : memref<8x5xf32, #tpu.memory_space<vmem>>, vector<8x5xf32>
    %c0_1 = arith.constant 0 : index
    %c0_2 = arith.constant 0 : index
    %1 = vector.load %arg4[%c0_1, %c0_2] : memref<1x128xf32, #tpu.memory_space<vmem>>, vector<1x128xf32>
    %2 = vector.extract_strided_slice %0 {offsets = [0, 0], sizes = [8, 1], strides = [1, 1]} : vector<8x5xf32> to vector<8x1xf32>
    %c0_3 = arith.constant 0 : index
    %c0_4 = arith.constant 0 : index
    %3 = vector.load %arg3[%c0_3, %c0_4] : memref<8x128xf32, #tpu.memory_space<vmem>>, vector<1x128xf32>
    %4 = vector.shape_cast %3 : vector<1x128xf32> to vector<128xf32>
    %5 = vector.shape_cast %4 : vector<128xf32> to vector<1x128xf32>
    %6 = vector.broadcast %2 : vector<8x1xf32> to vector<8x128xf32>
    %7 = vector.broadcast %5 : vector<1x128xf32> to vector<8x128xf32>
    %8 = arith.mulf %6, %7 : vector<8x128xf32>
    %9 = vector.broadcast %1 : vector<1x128xf32> to vector<8x128xf32>
    %10 = arith.addf %9, %8 : vector<8x128xf32>
    %11 = vector.extract_strided_slice %0 {offsets = [0, 1], sizes = [8, 1], strides = [1, 1]} : vector<8x5xf32> to vector<8x1xf32>
    %c1 = arith.constant 1 : index
    %c0_5 = arith.constant 0 : index
    %12 = vector.load %arg3[%c1, %c0_5] : memref<8x128xf32, #tpu.memory_space<vmem>>, vector<1x128xf32>
    %13 = vector.shape_cast %12 : vector<1x128xf32> to vector<128xf32>
    %14 = vector.shape_cast %13 : vector<128xf32> to vector<1x128xf32>
    %15 = vector.broadcast %11 : vector<8x1xf32> to vector<8x128xf32>
    %16 = vector.broadcast %14 : vector<1x128xf32> to vector<8x128xf32>
    %17 = arith.mulf %15, %16 : vector<8x128xf32>
    %18 = arith.addf %10, %17 : vector<8x128xf32>
    %19 = vector.extract_strided_slice %0 {offsets = [0, 2], sizes = [8, 1], strides = [1, 1]} : vector<8x5xf32> to vector<8x1xf32>
    %c2 = arith.constant 2 : index
    %c0_6 = arith.constant 0 : index
    %20 = vector.load %arg3[%c2, %c0_6] : memref<8x128xf32, #tpu.memory_space<vmem>>, vector<1x128xf32>
    %21 = vector.shape_cast %20 : vector<1x128xf32> to vector<128xf32>
    %22 = vector.shape_cast %21 : vector<128xf32> to vector<1x128xf32>
    %23 = vector.broadcast %19 : vector<8x1xf32> to vector<8x128xf32>
    %24 = vector.broadcast %22 : vector<1x128xf32> to vector<8x128xf32>
    %25 = arith.mulf %23, %24 : vector<8x128xf32>
    %26 = arith.addf %18, %25 : vector<8x128xf32>
    %27 = vector.extract_strided_slice %0 {offsets = [0, 3], sizes = [8, 1], strides = [1, 1]} : vector<8x5xf32> to vector<8x1xf32>
    %c3 = arith.constant 3 : index
    %c0_7 = arith.constant 0 : index
    %28 = vector.load %arg3[%c3, %c0_7] : memref<8x128xf32, #tpu.memory_space<vmem>>, vector<1x128xf32>
    %29 = vector.shape_cast %28 : vector<1x128xf32> to vector<128xf32>
    %30 = vector.shape_cast %29 : vector<128xf32> to vector<1x128xf32>
    %31 = vector.broadcast %27 : vector<8x1xf32> to vector<8x128xf32>
    %32 = vector.broadcast %30 : vector<1x128xf32> to vector<8x128xf32>
    %33 = arith.mulf %31, %32 : vector<8x128xf32>
    %34 = arith.addf %26, %33 : vector<8x128xf32>
    %35 = vector.extract_strided_slice %0 {offsets = [0, 4], sizes = [8, 1], strides = [1, 1]} : vector<8x5xf32> to vector<8x1xf32>
    %c4 = arith.constant 4 : index
    %c0_8 = arith.constant 0 : index
    %36 = vector.load %arg3[%c4, %c0_8] : memref<8x128xf32, #tpu.memory_space<vmem>>, vector<1x128xf32>
    %37 = vector.shape_cast %36 : vector<1x128xf32> to vector<128xf32>
    %38 = vector.shape_cast %37 : vector<128xf32> to vector<1x128xf32>
    %39 = vector.broadcast %35 : vector<8x1xf32> to vector<8x128xf32>
    %40 = vector.broadcast %38 : vector<1x128xf32> to vector<8x128xf32>
    %41 = arith.mulf %39, %40 : vector<8x128xf32>
    %42 = arith.addf %34, %41 : vector<8x128xf32>
    %c0_9 = arith.constant 0 : index
    %c0_10 = arith.constant 0 : index
    %43 = vector.load %arg1[%c0_9, %c0_10] : memref<8x1xi32, #tpu.memory_space<vmem>>, vector<8x1xi32>
    %c0_i32 = arith.constant 0 : i32
    %44 = vector.broadcast %c0_i32 : i32 to vector<8x1xi32>
    %45 = arith.cmpi eq, %43, %44 : vector<8x1xi32>
    %46 = vector.extract_strided_slice %42 {offsets = [0, 0], sizes = [8, 8], strides = [1, 1]} : vector<8x128xf32> to vector<8x8xf32>
    %47 = vector.extract_strided_slice %42 {offsets = [0, 8], sizes = [8, 8], strides = [1, 1]} : vector<8x128xf32> to vector<8x8xf32>
    %48 = vector.shape_cast %45 : vector<8x1xi1> to vector<8x1xi1>
    %49 = vector.broadcast %48 : vector<8x1xi1> to vector<8x8xi1>
    %50 = arith.select %49, %46, %47 : vector<8x8xi1>, vector<8x8xf32>
    %c0_11 = arith.constant 0 : index
    %c0_12 = arith.constant 0 : index
    %51 = vector.load %arg5[%c0_11, %c0_12] : memref<8x8xf32, #tpu.memory_space<vmem>>, vector<8x8xf32>
    tpu.vector_store %arg5[%c0_11, %c0_12], %50 {strides = array<i32>} : memref<8x8xf32, #tpu.memory_space<vmem>>, vector<8x8xf32>,
    return
  }
  func.func @transform_0(%arg0: i32) -> (i32, i32) {
    %c0_i32 = arith.constant 0 : i32
    %c0_i32_0 = arith.constant 0 : i32
    return %arg0, %c0_i32 : i32, i32
  }
  func.func @transform_1(%arg0: i32) -> (i32, i32) {
    %c0_i32 = arith.constant 0 : i32
    %c0_i32_0 = arith.constant 0 : i32
    return %arg0, %c0_i32 : i32, i32
  }
  func.func @transform_2(%arg0: i32) -> (i32, i32) {
    %c0_i32 = arith.constant 0 : i32
    %c0_i32_0 = arith.constant 0 : i32
    %c0_i32_1 = arith.constant 0 : i32
    return %c0_i32, %c0_i32_0 : i32, i32
  }
  func.func @transform_3(%arg0: i32) -> (i32, i32) {
    %c0_i32 = arith.constant 0 : i32
    %c0_i32_0 = arith.constant 0 : i32
    %c0_i32_1 = arith.constant 0 : i32
    return %c0_i32, %c0_i32_0 : i32, i32
  }
  func.func @transform_4(%arg0: i32) -> (i32, i32) {
    %c0_i32 = arith.constant 0 : i32
    %c0_i32_0 = arith.constant 0 : i32
    return %arg0, %c0_i32 : i32, i32
  }
}

</mosaic_0001>

<bundles_post_ra>
// kernel: testmodel_forward.1
= control target key start
LH: loop header
LB: loop body
LE: loop exit
PB: predicated region body
PF: predicated region fallthrough
CT: control target
= control target key end

     0   :  { %9 = vsyncpa [#allocation3], 0  ;;  %s153_s15 = smov [#allocation2]   ;;  %s200_s0 = inlined_call_operand.vmem [shape: s32[8,1], index: 0, kind: input, shape index: {}]   ;;  %s201_s1 = inlined_call_operand.vmem [shape: f32[8,5], index: 1, kind: input, shape index: {}]   ;;  %s202_s2 = inlined_call_operand.hbm [shape: f32[8,128], index: 2, kind: input, shape index: {}]   ;;  %s203_s3 = inlined_call_operand.vmem [shape: f32[1,128], index: 3, kind: input, shape index: {}]   ;;  %s204_s4 = inlined_call_operand.vmem [shape: f32[8,8], index: 4, kind: output, shape index: {}]  }
   0x1   :  { %s20_s16 = sshll.u32 %s153_s15, 4  ;;  %s21_s16 = int_to_ptr.vmem [resolvable:$true] %s20_s16 }
   0x2   :  { %s139_s17 = scalar_lea.vmem %s21_s16, 128  ;;  %p144_p1 = scmp.lt.s32.totalorder %s21_s16, %s21_s16 }
   0x3   :  { %p140_p0 = scmp.ne.s32.totalorder %s21_s16, %s139_s17  ;;  %p145_p2 = scmp.lt.s32.totalorder %s139_s17, %s139_s17 }
   0x5   :  { %p146_p3 = por %p145_p2, %p144_p1 }
   0x7   :  { %p147_p4 = pnand %p146_p3, %p140_p0 }
   0x9   :  { %150 = shalt.err (!%p147_p4)
}
   0xa   :  { %23 = dma.hbm_to_vmem [thread:$0]  %s202_s2, 128, %s21_s16, [#allocation3]  }
   0xb   :  { %151 = dma.done.wait [#allocation3], 128  }
   0xc   :  { %152 = vsyncadd [#allocation3], 4294967168  ;;  %v154_v0 = vmov 0   ;;  %v155_v1 = vmov 2   ;;  %v29_v2 = vld [vmem:[%s201_s1] sm:$0xff]  ;;  %v156_v4 = vmov 1  }
   0xd   :  { %125 = vset.pattern.permute.xlu0 %v154_v0  ;;  %127 = vset.pattern.permute.xlu1 %v155_v1  ;;  %v93_v3 = vld [vmem:[%s200_s0] sm:$0xff]  ;;  %v157_v5 = vmov 3   ;;  %v158_v7 = vmov 4   ;;  %s159_s0 = smov 120   ;;  %vm105_vm2 = vcmask 64512  }
   0xe   :  { %34 = vperm.xlu0 %125, %v29_v2   ;;  %62 = vperm.xlu1 %127, %v29_v2   ;;  %vm94_vm0 = vcmp.eq.s32.totalorder %v93_v3, 0  ;;  %v112_v8 = vld [vmem:[#allocation2] ss:$0 sm:$0xff]  ;;  %v114_v13 = vld [vmem:[#allocation2 + $0x1] ss:$0 sm:$0xff] }
   0xf   :  { %v95_v6 = vsel %vm94_vm0, 1, %v154_v0  ;;  %v113_v12 = vld [vmem:[%s203_s3] ss:$0 sm:$0xff]  ;;  %v115_v14 = vld [vmem:[#allocation2 + $0x2] ss:$0 sm:$0xff] }
  0x10   :  { %v116_v19 = vld [vmem:[#allocation2 + $0x3] ss:$0 sm:$0xff]  ;;  %v117_v22 = vld [vmem:[#allocation2 + $0x4] ss:$0 sm:$0xff] }
  0x12   :  { %126 = vset.pattern.permute.xlu0 %v156_v4  ;;  %128 = vset.pattern.permute.xlu1 %v157_v5 }
  0x13   :  { %51 = vperm.xlu0 %126, %v29_v2   ;;  %73 = vperm.xlu1 %128, %v29_v2  }
  0x17   :  { %129 = vset.pattern.permute.xlu1 %v158_v7  ;;  %130 = vset.pattern.permute.xlu0 %v154_v0 }
  0x18   :  { %84 = vperm.xlu1 %129, %v29_v2   ;;  %97 = vperm.xlu0 %130, %v95_v6  }
  0x89   :  { %v35_v9 = vpop.permute.xlu0 %34  ;;  %v63_v10 = vpop.permute.xlu1 %62 }
  0x8a   :  { %v41_v11 = vmul.f32 %v112_v8, %v35_v9  ;;  %v69_v20 = vmul.f32 %v115_v14, %v63_v10 }
  0x8c   :  { %v48_v17 = vadd.f32 %v113_v12, %v41_v11 }
  0x8e   :  { %v52_v15 = vpop.permute.xlu0 %51  ;;  %v74_v16 = vpop.permute.xlu1 %73 }
  0x8f   :  { %v58_v18 = vmul.f32 %v114_v13, %v52_v15  ;;  %v80_v24 = vmul.f32 %v116_v19, %v74_v16 }
  0x91   :  { %v59_v21 = vadd.f32 %v58_v18, %v48_v17 }
  0x93   :  { %v70_v23 = vadd.f32 %v69_v20, %v59_v21  ;;  %v85_v25 = vpop.permute.xlu1 %84  ;;  %v98_v29 = vpop.permute.xlu0 %97 }
  0x94   :  { %v91_v26 = vmul.f32 %v117_v22, %v85_v25  ;;  %vm99_vm1 = vcmp.eq.s32.totalorder %v98_v29, 1 }
  0x95   :  { %v81_v27 = vadd.f32 %v80_v24, %v70_v23 }
  0x97   :  { %v92_v28 = vadd.f32 %v91_v26, %v81_v27 }
  0x99   :  { %101 = vrot.lane.b32.xlu1 %v92_v28, %s159_s0 }
 0x10b   :  { %v102_v30 = vpop.permute.xlu1 %101 }
 0x10c   :  { %v104_v31 = vsel %vm99_vm1, %v92_v28, %v102_v30 }
 0x10d   :  { %106 = vst.msk [vmem:[%s204_s4] sm:$0xff] %vm105_vm2, %v104_v31 }
 0x10e   :  { %111 = vsyncpa [#allocation3], 1 }

</bundles_post_ra>
